<compile_context>
chip_gen: v5e
topology: v5e:2x2
jax: 0.10.0
libtpu: 0.0.40
codegen_flags: <defaults>
</compile_context>

<pallas_src>
import jax
import jax.numpy as jnp
from jax.experimental import pallas as pl
from jax.experimental.pallas import tpu as pltpu


def _round_up(x, m):
    return ((x + m - 1) // m) * m


def _pick_block_m(B, block_m_max):
    """Batch tile size. Small B -> one full-extent tile (legal, no padding/masking).
    Large B -> >=2 tiles (feeds both v7x TensorCores), capped at block_m_max."""
    if B <= 256:
        return B
    half = _round_up(pl.cdiv(B, 2), 128)
    return min(block_m_max, half)


def _qnetwork_kernel(x_ref, w1_ref, b1_ref, w2_ref, b2_ref, w3_ref, b3_ref, out_ref):
    """fc3(relu(fc2(relu(fc1(x))))) for one batch tile, fully in VMEM."""
    x = x_ref[...]                                                       # (BM, d_in)

    h1 = jnp.dot(x, w1_ref[...], preferred_element_type=jnp.float32) + b1_ref[...]
    h1 = jnp.maximum(h1, 0.0)

    h2 = jnp.dot(h1, w2_ref[...], preferred_element_type=jnp.float32) + b2_ref[...]
    h2 = jnp.maximum(h2, 0.0)

    y = jnp.dot(h2, w3_ref[...], preferred_element_type=jnp.float32) + b3_ref[...]
    out_ref[...] = y.astype(out_ref.dtype)                               # (BM, d_out)


def qnetwork_forward(x, params, *, block_m_max=512):
    """Pallas forward. x: (B, input_size) float32. params: dict w1,b1,w2,b2,w3,b3
    with weights stored pre-transposed as (in_features, out_features)."""
    w1, b1, w2, b2, w3, b3 = (params[k] for k in ("w1", "b1", "w2", "b2", "w3", "b3"))
    B, d_in = x.shape
    d_out = w3.shape[1]

    block_m = _pick_block_m(B, block_m_max)
    grid = (pl.cdiv(B, block_m),)

    # Resident (constant index_map) full-extent blocks for the parameters.
    resident = lambda a: pl.BlockSpec(a.shape, lambda i: (0, 0))

    out = pl.pallas_call(
        _qnetwork_kernel,
        out_shape=jax.ShapeDtypeStruct((B, d_out), jnp.float32),
        grid_spec=pltpu.PrefetchScalarGridSpec(
            num_scalar_prefetch=0,
            grid=grid,
            in_specs=[
                pl.BlockSpec((block_m, d_in), lambda i: (i, 0)),   # x tile (streamed)
                resident(w1), resident(b1),                        # fc1 params (resident)
                resident(w2), resident(b2),                        # fc2 params
                resident(w3), resident(b3),                        # fc3 params
            ],
            out_specs=pl.BlockSpec((block_m, d_out), lambda i: (i, 0)),
        ),
        compiler_params=pltpu.CompilerParams(
            dimension_semantics=("parallel",),
        ),
    )(x, w1, b1, w2, b2, w3, b3)

    return out


def init_qnetwork_params(key, input_size, output_size, fc1_units=64, fc2_units=64):
    """PyTorch nn.Linear-style init: U(-1/sqrt(fan_in), 1/sqrt(fan_in))."""
    keys = jax.random.split(key, 6)

    def linear(kw, kb, fan_in, fan_out):
        bound = 1.0 / jnp.sqrt(jnp.float32(fan_in))
        # stored pre-transposed: (fan_in, fan_out) so the kernel computes x @ W
        w = jax.random.uniform(kw, (fan_in, fan_out), jnp.float32, -bound, bound)
        b = jax.random.uniform(kb, (1, fan_out), jnp.float32, -bound, bound)
        return w, b

    w1, b1 = linear(keys[0], keys[1], input_size, fc1_units)
    w2, b2 = linear(keys[2], keys[3], fc1_units, fc2_units)
    w3, b3 = linear(keys[4], keys[5], fc2_units, output_size)
    return {"w1": w1, "b1": b1, "w2": w2, "b2": b2, "w3": w3, "b3": b3}


def qnetwork_reference(x, params):
    """Pure-JAX reference for correctness check."""
    h1 = jnp.maximum(x @ params["w1"] + params["b1"], 0.0)
    h2 = jnp.maximum(h1 @ params["w2"] + params["b2"], 0.0)
    return h2 @ params["w3"] + params["b3"]


if __name__ == "__main__":
    key = jax.random.PRNGKey(0)
    k_params, k_x = jax.random.split(key)

    input_size, output_size = 8, 4    # e.g. state_dim=8, n_actions=4
    batch = 2

    params = init_qnetwork_params(k_params, input_size, output_size,
                                  fc1_units=64, fc2_units=64)
    x = jax.random.normal(k_x, (batch, input_size), jnp.float32)

    out = qnetwork_forward(x, params)
    out = jax.block_until_ready(out)

    ref = qnetwork_reference(x, params)
    assert out.shape == (batch, output_size), out.shape
    assert jnp.allclose(out, ref, atol=1e-5, rtol=1e-5), (out, ref)

    # Also exercise a larger, non-divisible batch (partial last tile + multi-tile grid).
    xb = jax.random.normal(jax.random.PRNGKey(1), (1000, input_size), jnp.float32)
    outb = jax.block_until_ready(qnetwork_forward(xb, params))
    refb = qnetwork_reference(xb, params)
    assert outb.shape == (1000, output_size), outb.shape
    assert jnp.allclose(outb, refb, atol=1e-5, rtol=1e-5)

    print("KERNEL_OK")
</pallas_src>

<mosaic_0001>
module attributes {stable_mosaic.version = 11 : i64} {
  func.func @_qnetwork_kernel(%arg0: i32, %arg1: memref<2x8xf32, #tpu.memory_space<vmem>>, %arg2: memref<8x64xf32, #tpu.memory_space<vmem>>, %arg3: memref<1x64xf32, #tpu.memory_space<vmem>>, %arg4: memref<64x64xf32, #tpu.memory_space<vmem>>, %arg5: memref<1x64xf32, #tpu.memory_space<vmem>>, %arg6: memref<64x4xf32, #tpu.memory_space<vmem>>, %arg7: memref<1x4xf32, #tpu.memory_space<vmem>>, %arg8: memref<2x4xf32, #tpu.memory_space<vmem>>) attributes {dimension_semantics = [#tpu.dimension_semantics<parallel>], iteration_bounds = array<i64: 1>, scalar_prefetch = 0 : i64, scratch_operands = 0 : i64, tpu.core_type = #tpu.core_type<tc>, window_params = [{transform_indices = @transform_0, window_bounds = array<i64: 2, 8>}, {pipeline_mode = #tpu.pipeline_mode<synchronous>, transform_indices = @transform_1, window_bounds = array<i64: 8, 64>}, {pipeline_mode = #tpu.pipeline_mode<synchronous>, transform_indices = @transform_2, window_bounds = array<i64: 1, 64>}, {pipeline_mode = #tpu.pipeline_mode<synchronous>, transform_indices = @transform_3, window_bounds = array<i64: 64, 64>}, {pipeline_mode = #tpu.pipeline_mode<synchronous>, transform_indices = @transform_4, window_bounds = array<i64: 1, 64>}, {pipeline_mode = #tpu.pipeline_mode<synchronous>, transform_indices = @transform_5, window_bounds = array<i64: 64, 4>}, {pipeline_mode = #tpu.pipeline_mode<synchronous>, transform_indices = @transform_6, window_bounds = array<i64: 1, 4>}, {transform_indices = @transform_7, window_bounds = array<i64: 2, 4>}]} {
    %c0 = arith.constant 0 : index
    %c0_0 = arith.constant 0 : index
    %0 = vector.load %arg1[%c0, %c0_0] : memref<2x8xf32, #tpu.memory_space<vmem>>, vector<2x8xf32>
    %c0_1 = arith.constant 0 : index
    %c0_2 = arith.constant 0 : index
    %1 = vector.load %arg2[%c0_1, %c0_2] : memref<8x64xf32, #tpu.memory_space<vmem>>, vector<8x64xf32>
    %cst = arith.constant dense<0.000000e+00> : vector<2x64xf32>
    %2 = tpu.matmul %0, %1, %cst {dimension_numbers = #tpu.dot_dimension_numbers<[1], [0], [0], [1], [0, 0, 1, 1], [], []>} : vector<2x8xf32>, vector<8x64xf32>, vector<2x64xf32> -> vector<2x64xf32>
    %c0_3 = arith.constant 0 : index
    %c0_4 = arith.constant 0 : index
    %3 = vector.load %arg3[%c0_3, %c0_4] : memref<1x64xf32, #tpu.memory_space<vmem>>, vector<1x64xf32>
    %4 = vector.broadcast %3 : vector<1x64xf32> to vector<2x64xf32>
    %5 = arith.addf %2, %4 : vector<2x64xf32>
    %cst_5 = arith.constant 0.000000e+00 : f32
    %6 = vector.broadcast %cst_5 : f32 to vector<2x64xf32>
    %7 = arith.maximumf %5, %6 : vector<2x64xf32>
    %c0_6 = arith.constant 0 : index
    %c0_7 = arith.constant 0 : index
    %8 = vector.load %arg4[%c0_6, %c0_7] : memref<64x64xf32, #tpu.memory_space<vmem>>, vector<64x64xf32>
    %cst_8 = arith.constant dense<0.000000e+00> : vector<2x64xf32>
    %9 = tpu.matmul %7, %8, %cst_8 {dimension_numbers = #tpu.dot_dimension_numbers<[1], [0], [0], [1], [0, 0, 1, 1], [], []>} : vector<2x64xf32>, vector<64x64xf32>, vector<2x64xf32> -> vector<2x64xf32>
    %c0_9 = arith.constant 0 : index
    %c0_10 = arith.constant 0 : index
    %10 = vector.load %arg5[%c0_9, %c0_10] : memref<1x64xf32, #tpu.memory_space<vmem>>, vector<1x64xf32>
    %11 = vector.broadcast %10 : vector<1x64xf32> to vector<2x64xf32>
    %12 = arith.addf %9, %11 : vector<2x64xf32>
    %cst_11 = arith.constant 0.000000e+00 : f32
    %13 = vector.broadcast %cst_11 : f32 to vector<2x64xf32>
    %14 = arith.maximumf %12, %13 : vector<2x64xf32>
    %c0_12 = arith.constant 0 : index
    %c0_13 = arith.constant 0 : index
    %15 = vector.load %arg6[%c0_12, %c0_13] : memref<64x4xf32, #tpu.memory_space<vmem>>, vector<64x4xf32>
    %cst_14 = arith.constant dense<0.000000e+00> : vector<2x4xf32>
    %16 = tpu.matmul %14, %15, %cst_14 {dimension_numbers = #tpu.dot_dimension_numbers<[1], [0], [0], [1], [0, 0, 1, 1], [], []>} : vector<2x64xf32>, vector<64x4xf32>, vector<2x4xf32> -> vector<2x4xf32>
    %c0_15 = arith.constant 0 : index
    %c0_16 = arith.constant 0 : index
    %17 = vector.load %arg7[%c0_15, %c0_16] : memref<1x4xf32, #tpu.memory_space<vmem>>, vector<1x4xf32>
    %18 = vector.broadcast %17 : vector<1x4xf32> to vector<2x4xf32>
    %19 = arith.addf %16, %18 : vector<2x4xf32>
    %c0_17 = arith.constant 0 : index
    %c0_18 = arith.constant 0 : index
    %20 = vector.load %arg8[%c0_17, %c0_18] : memref<2x4xf32, #tpu.memory_space<vmem>>, vector<2x4xf32>
    tpu.vector_store %arg8[%c0_17, %c0_18], %19 {strides = array<i32>} : memref<2x4xf32, #tpu.memory_space<vmem>>, vector<2x4xf32>,
    return
  }
  func.func @transform_0(%arg0: i32) -> (i32, i32) {
    %c0_i32 = arith.constant 0 : i32
    %c0_i32_0 = arith.constant 0 : i32
    return %arg0, %c0_i32 : i32, i32
  }
  func.func @transform_1(%arg0: i32) -> (i32, i32) {
    %c0_i32 = arith.constant 0 : i32
    %c0_i32_0 = arith.constant 0 : i32
    %c0_i32_1 = arith.constant 0 : i32
    return %c0_i32, %c0_i32_0 : i32, i32
  }
  func.func @transform_2(%arg0: i32) -> (i32, i32) {
    %c0_i32 = arith.constant 0 : i32
    %c0_i32_0 = arith.constant 0 : i32
    %c0_i32_1 = arith.constant 0 : i32
    return %c0_i32, %c0_i32_0 : i32, i32
  }
  func.func @transform_3(%arg0: i32) -> (i32, i32) {
    %c0_i32 = arith.constant 0 : i32
    %c0_i32_0 = arith.constant 0 : i32
    %c0_i32_1 = arith.constant 0 : i32
    return %c0_i32, %c0_i32_0 : i32, i32
  }
  func.func @transform_4(%arg0: i32) -> (i32, i32) {
    %c0_i32 = arith.constant 0 : i32
    %c0_i32_0 = arith.constant 0 : i32
    %c0_i32_1 = arith.constant 0 : i32
    return %c0_i32, %c0_i32_0 : i32, i32
  }
  func.func @transform_5(%arg0: i32) -> (i32, i32) {
    %c0_i32 = arith.constant 0 : i32
    %c0_i32_0 = arith.constant 0 : i32
    %c0_i32_1 = arith.constant 0 : i32
    return %c0_i32, %c0_i32_0 : i32, i32
  }
  func.func @transform_6(%arg0: i32) -> (i32, i32) {
    %c0_i32 = arith.constant 0 : i32
    %c0_i32_0 = arith.constant 0 : i32
    %c0_i32_1 = arith.constant 0 : i32
    return %c0_i32, %c0_i32_0 : i32, i32
  }
  func.func @transform_7(%arg0: i32) -> (i32, i32) {
    %c0_i32 = arith.constant 0 : i32
    %c0_i32_0 = arith.constant 0 : i32
    return %arg0, %c0_i32 : i32, i32
  }
}

</mosaic_0001>

<bundles_post_ra>
// kernel: tpu_custom_call.1
= control target key start
LH: loop header
LB: loop body
LE: loop exit
PB: predicated region body
PF: predicated region fallthrough
CT: control target
= control target key end

     0   :  { %12 = vsyncpa [#allocation3], 0  ;;  %s331_s0 = inlined_call_operand.vmem [shape: f32[2,8], index: 0, kind: input, shape index: {}]   ;;  %s332_s1 = inlined_call_operand.hbm [shape: f32[8,64], index: 1, kind: input, shape index: {}]   ;;  %s333_s2 = inlined_call_operand.vmem [shape: f32[1,64], index: 2, kind: input, shape index: {}]   ;;  %s334_s3 = inlined_call_operand.vmem [shape: f32[64,64], index: 3, kind: input, shape index: {}]   ;;  %s335_s4 = inlined_call_operand.vmem [shape: f32[1,64], index: 4, kind: input, shape index: {}]   ;;  %s336_s5 = inlined_call_operand.vmem [shape: f32[64,4], index: 5, kind: input, shape index: {}]   ;;  %s337_s6 = inlined_call_operand.vmem [shape: f32[1,4], index: 6, kind: input, shape index: {}]   ;;  %s338_s7 = inlined_call_operand.hbm [shape: f32[2,4], index: 7, kind: output, shape index: {}]  }
   0x1   :  { %13 = vsyncpa [#allocation4], 0  ;;  %s21_s26 = sshll.u32 %s332_s1, 4  ;;  %s223_s27 = smov [#allocation2]   ;;  %s22_s26 = int_to_ptr.hbm [resolvable:$true] %s21_s26 }
   0x2   :  { %s23_s28 = sshll.u32 %s223_s27, 4  ;;  %s24_s28 = int_to_ptr.vmem [resolvable:$true] %s23_s28 }
   0x3   :  { %26 = dma.hbm_to_vmem [thread:$0]  %s22_s26, 128, %s24_s28, [#allocation3]  }
   0x4   :  { %219 = dma.done.wait [#allocation3], 128  }
   0x5   :  { %220 = vsyncadd [#allocation3], 4294967168  ;;  %vm47_vm0 = vcmask 64512   ;;  %v42_v0 = vld [vmem:[#allocation2] sm:$0xff]  ;;  %v79_v2 = vld [vmem:[%s334_s3 + $0x38] sm:$0xff]  ;;  %vm84_vm1 = vcmask 523264  }
   0x6   :  { %v41_v1 = vld [vmem:[%s331_s0] sm:$0x3]  ;;  %66 = vmatpush.msra.mxu0 %v42_v0  ;;  %96 = vmatpush.msra.mxu1 %v79_v2  ;;  %v78_v3 = vld [vmem:[%s334_s3 + $0x30] sm:$0xff]  ;;  %v77_v4 = vld [vmem:[%s334_s3 + $0x28] sm:$0xff]  ;;  %s224_s17 = smov [#allocation5]   ;;  %s153_s21 = sshll.u32 %s338_s7, 4  ;;  %s154_s21 = int_to_ptr.hbm [resolvable:$true] %s153_s21 }
   0x7   :  { %163 = vmatmul.msk.f32.vlgmr.msra.gmra.mxu0 %vm47_vm0, %v41_v1  ;;  %v76_v5 = vld [vmem:[%s334_s3 + $0x20] sm:$0xff]  ;;  %v75_v6 = vld [vmem:[%s334_s3 + $0x18] sm:$0xff]  ;;  %v74_v7 = vld [vmem:[%s334_s3 + $0x10] sm:$0xff]  ;;  %s151_s18 = sshll.u32 %s224_s17, 4  ;;  %vm144_vm2 = vcmask 25600   ;;  %s152_s18 = int_to_ptr.vmem [resolvable:$true] %s151_s18 }
   0x8   :  { %97 = vmatpush.msra.mxu1 %v78_v3  ;;  %v73_v8 = vld [vmem:[%s334_s3 + $0x8] sm:$0xff]  ;;  %v72_v9 = vld [vmem:[%s334_s3] sm:$0xff]  ;;  %v116_v10 = vld [vmem:[%s336_s5 + $0x38] sm:$0xff] }
   0x9   :  { %v115_v11 = vld [vmem:[%s336_s5 + $0x30] sm:$0xff]  ;;  %132 = vmatpush.msra.mxu2 %v116_v10  ;;  %v114_v12 = vld [vmem:[%s336_s5 + $0x28] sm:$0xff]  ;;  %v113_v13 = vld [vmem:[%s336_s5 + $0x20] sm:$0xff] }
   0xa   :  { %98 = vmatpush.msra.mxu1 %v77_v4  ;;  %v112_v14 = vld [vmem:[%s336_s5 + $0x18] sm:$0xff]  ;;  %v168_v15 = vld [vmem:[%s333_s2] ss:$0 sm:$0xff]  ;;  %v111_v19 = vld [vmem:[%s336_s5 + $0x10] sm:$0xff] }
   0xb   :  { %133 = vmatpush.msra.mxu2 %v115_v11  ;;  %v110_v20 = vld [vmem:[%s336_s5 + $0x8] sm:$0xff]  ;;  %v109_v21 = vld [vmem:[%s336_s5] sm:$0xff] }
   0xc   :  { %99 = vmatpush.msra.mxu1 %v76_v5  ;;  %v169_v22 = vld [vmem:[%s335_s4] ss:$0 sm:$0xff] }
   0xd   :  { %134 = vmatpush.msra.mxu2 %v114_v12  ;;  %v170_v26 = vld [vmem:[%s337_s6] ss:$0 sm:$0xff] }
   0xe   :  { %100 = vmatpush.msra.mxu1 %v75_v6 }
   0xf   :  { %135 = vmatpush.msra.mxu2 %v113_v13 }
  0x10   :  { %101 = vmatpush.msra.mxu1 %v74_v7 }
  0x11   :  { %136 = vmatpush.msra.mxu2 %v112_v14 }
  0x12   :  { %102 = vmatpush.msra.mxu1 %v73_v8 }
  0x13   :  { %137 = vmatpush.msra.mxu2 %v111_v19 }
  0x14   :  { %103 = vmatpush.msra.mxu1 %v72_v9 }
  0x15   :  { %138 = vmatpush.msra.mxu2 %v110_v20 }
  0x17   :  { %139 = vmatpush.msra.mxu2 %v109_v21 }
  0x84   :  { %v68_v16 = vpop.f32.mrf.mxu0 }
  0x85   :  { %v69_v17 = vadd.f32 %v168_v15, %v68_v16 }
  0x87   :  { %v71_v18 = vmax.f32 %v69_v17, 0.0 }
  0x89   :  { %164 = vmatmul.msk.f32.vlgmr.msra.gmra.mxu1 %vm84_vm1, %v71_v18 }
 0x106   :  { %v105_v23 = vpop.f32.mrf.mxu1 }
 0x107   :  { %v106_v24 = vadd.f32 %v169_v22, %v105_v23 }
 0x109   :  { %v108_v25 = vmax.f32 %v106_v24, 0.0 }
 0x10b   :  { %165 = vmatmul.msk.f32.vlgmr.msra.gmra.mxu2 %vm84_vm1, %v108_v25 }
 0x18e   :  { %v141_v27 = vpop.f32.mrf.mxu2 }
 0x18f   :  { %v142_v28 = vadd.f32 %v170_v26, %v141_v27 }
 0x191   :  { %145 = vst.msk [vmem:[#allocation5] sm:$0x3] %vm144_vm2, %v142_v28 }
 0x192   :  { %156 = dma.vmem_to_hbm [thread:$0]  %s152_s18, 32, %s154_s21, [#allocation4]  }
 0x193   :  { %221 = dma.done.wait [#allocation4], 32  }
 0x194   :  { %222 = vsyncadd [#allocation4], 4294967264 }
 0x195   :  { %161 = vsyncpa [#allocation3], 1 }
 0x196   :  { %162 = vsyncpa [#allocation4], 1 }

</bundles_post_ra>
